<compile_context>
chip_gen: v7x
topology: tpu7x:2x2x1
jax: 0.10.0
libtpu: 0.0.40
codegen_flags: <defaults>
</compile_context>

<pallas_src>
import math
import numpy as np
import jax
import jax.numpy as jnp
from jax.experimental import pallas as pl
from jax.experimental.pallas import tpu as pltpu


def _pe_kernel(times_ref,   # VMEM (tile_rows, G)  G packed P_time values per output row
               w_ref,       # VMEM (G, W)          w[g, c] = inv_ts[c % out_dim] if c//out_dim==g else 0
               phase_ref,   # VMEM (1, W)          0 for sin lanes, pi/2 for cos lanes
               out_ref):    # VMEM (tile_rows, W)  lane-dense output block (W = G * out_dim)
    g_count = w_ref.shape[0]
    t = times_ref[...]                      # (tile_rows, G)
    w = w_ref[...]                          # (G, W)
    # scaled[r, c] = phase[c] + t[r, c // out_dim] * inv_ts[c % out_dim]
    # built with G rank-1 mul-adds (column lane-broadcast x row sublane-broadcast).
    scaled = phase_ref[...]                 # (1, W); broadcasts up on first add
    for g in range(g_count):                # static unroll, G is small (1..16)
        scaled = scaled + t[:, g:g + 1] * w[g:g + 1, :]
    # cos folded into sin via the phase vector -> single full-width op, single store.
    out_ref[...] = jnp.sin(scaled).astype(out_ref.dtype)


def positional_encoding_tf(P_time, d_model, max_len=500, *,
                           block_bytes=2 * 1024 * 1024,
                           out_dtype=jnp.float32):
    """P_time: (T, B) -> pe: (T, B, 2 * (d_model // 2))."""
    T, B = P_time.shape
    H = d_model // 2
    assert H >= 1, "d_model must be >= 2"
    out_dim = 2 * H                         # == d_model for even d_model (torch cat)
    M = T * B

    # Host-side constants (same float64 -> float32 path as the torch module).
    ts = max_len ** np.linspace(0.0, 1.0, H)                                   # float64
    inv_full = np.concatenate([1.0 / ts, 1.0 / ts]).astype(np.float32)         # (out_dim,)
    phase_full = np.concatenate([np.zeros(H), np.full(H, np.pi / 2.0)]).astype(np.float32)

    # Pack G rows of P_time per output row so the output lane axis is a multiple
    # of 128 (lane-dense stores, full VPU lane utilisation for narrow d_model).
    G = 1
    if out_dim < 128:
        g_lane = 128 // math.gcd(out_dim, 128)      # smallest G with (G*out_dim) % 128 == 0
        if g_lane <= 16 and M % g_lane == 0:        # cap VPU expansion overhead; need clean reshape
            G = g_lane
    W = G * out_dim

    w_mat = np.zeros((G, W), np.float32)
    for g in range(G):
        w_mat[g, g * out_dim:(g + 1) * out_dim] = inv_full
    phase = np.tile(phase_full, G).reshape(1, W)

    times = P_time.astype(jnp.float32).reshape(M // G, G)   # free row-major reshape
    m_rows = M // G

    # Byte-sized row tile (~block_bytes per output block), multiple of 8 sublanes.
    tile_rows = int(min(max(1, block_bytes // (4 * W)), m_rows))
    if tile_rows < m_rows:
        tile_rows = max(8, (tile_rows // 8) * 8)
    grid = (pl.cdiv(m_rows, tile_rows),)    # ragged final block handled by Pallas masking

    out = pl.pallas_call(
        _pe_kernel,
        out_shape=jax.ShapeDtypeStruct((m_rows, W), out_dtype),
        grid=grid,
        in_specs=[
            pl.BlockSpec((tile_rows, G), lambda i: (i, 0)),   # packed P_time rows
            pl.BlockSpec((G, W), lambda i: (0, 0)),           # one-hot * inv_timescales (replicated)
            pl.BlockSpec((1, W), lambda i: (0, 0)),           # sin/cos phase vector (replicated)
        ],
        out_specs=pl.BlockSpec((tile_rows, W), lambda i: (i, 0)),
        compiler_params=pltpu.CompilerParams(dimension_semantics=("parallel",)),
    )(times, jnp.asarray(w_mat), jnp.asarray(phase))

    # Free row-major reshape back to (T, B, out_dim); no slicing, no extra HBM pass.
    return out.reshape(T, B, out_dim)


def ref_positional_encoding(P_time_np, d_model, max_len=500):
    """Numpy mirror of PositionalEncodingTF.getPE (torch semantics, float32)."""
    H = d_model // 2
    timescales = (max_len ** np.linspace(0.0, 1.0, H)).astype(np.float32)
    t = np.asarray(P_time_np, dtype=np.float32)[:, :, None]          # (T, B, 1)
    scaled = t / timescales[None, None, :]                           # (T, B, H)
    return np.concatenate([np.sin(scaled), np.cos(scaled)],
                          axis=-1).astype(np.float32)


if __name__ == "__main__":
    key = jax.random.PRNGKey(0)
    k1, k2 = jax.random.split(key)

    # Case 1: narrow d_model (out_dim = 32 < 128) -> packed path (G=4, 128-lane
    # blocks); tiny block_bytes forces a multi-step grid with a ragged last block.
    d_model, max_len, T, B = 32, 500, 50, 6          # M = 300, divisible by G = 4
    P_time = jax.random.uniform(k1, (T, B), jnp.float32, 0.0, 100.0)
    pe = jax.block_until_ready(
        positional_encoding_tf(P_time, d_model, max_len=max_len, block_bytes=16 * 1024))
    ref = ref_positional_encoding(np.asarray(P_time), d_model, max_len=max_len)
    assert pe.shape == (T, B, 2 * (d_model // 2))
    # tolerance: |t|*eps-scale rounding from mul-vs-div, the cos=sin(x+pi/2) fold,
    # and f32 sin range reduction; outputs are O(1).
    np.testing.assert_allclose(np.asarray(pe), ref, rtol=2e-4, atol=2e-4)

    # Case 2: wide d_model (out_dim = 256 >= 128) -> unpacked path (G = 1).
    d_model2, T2, B2 = 256, 9, 3
    P_time2 = jax.random.uniform(k2, (T2, B2), jnp.float32, 0.0, 100.0)
    pe2 = jax.block_until_ready(positional_encoding_tf(P_time2, d_model2, max_len=max_len))
    ref2 = ref_positional_encoding(np.asarray(P_time2), d_model2, max_len=max_len)
    assert pe2.shape == (T2, B2, 2 * (d_model2 // 2))
    np.testing.assert_allclose(np.asarray(pe2), ref2, rtol=2e-4, atol=2e-4)

    print("KERNEL_OK")
</pallas_src>

<mosaic_0001>
module attributes {stable_mosaic.version = 11 : i64} {
  func.func @_pe_kernel(%arg0: i32, %arg1: memref<32x4xf32, #tpu.memory_space<vmem>>, %arg2: memref<4x128xf32, #tpu.memory_space<vmem>>, %arg3: memref<1x128xf32, #tpu.memory_space<vmem>>, %arg4: memref<32x128xf32, #tpu.memory_space<vmem>>) attributes {dimension_semantics = [#tpu.dimension_semantics<parallel>], iteration_bounds = array<i64: 3>, scalar_prefetch = 0 : i64, scratch_operands = 0 : i64, tpu.core_type = #tpu.core_type<tc>, window_params = [{transform_indices = @transform_0, window_bounds = array<i64: 32, 4>}, {pipeline_mode = #tpu.pipeline_mode<synchronous>, transform_indices = @transform_1, window_bounds = array<i64: 4, 128>}, {pipeline_mode = #tpu.pipeline_mode<synchronous>, transform_indices = @transform_2, window_bounds = array<i64: 1, 128>}, {transform_indices = @transform_3, window_bounds = array<i64: 32, 128>}]} {
    %c0 = arith.constant 0 : index
    %c0_0 = arith.constant 0 : index
    %0 = vector.load %arg1[%c0, %c0_0] : memref<32x4xf32, #tpu.memory_space<vmem>>, vector<32x4xf32>
    %c0_1 = arith.constant 0 : index
    %c0_2 = arith.constant 0 : index
    %1 = vector.load %arg2[%c0_1, %c0_2] : memref<4x128xf32, #tpu.memory_space<vmem>>, vector<4x128xf32>
    %c0_3 = arith.constant 0 : index
    %c0_4 = arith.constant 0 : index
    %2 = vector.load %arg3[%c0_3, %c0_4] : memref<1x128xf32, #tpu.memory_space<vmem>>, vector<1x128xf32>
    %3 = vector.extract_strided_slice %0 {offsets = [0, 0], sizes = [32, 1], strides = [1, 1]} : vector<32x4xf32> to vector<32x1xf32>
    %4 = vector.extract_strided_slice %1 {offsets = [0, 0], sizes = [1, 128], strides = [1, 1]} : vector<4x128xf32> to vector<1x128xf32>
    %5 = vector.broadcast %3 : vector<32x1xf32> to vector<32x128xf32>
    %6 = vector.broadcast %4 : vector<1x128xf32> to vector<32x128xf32>
    %7 = arith.mulf %5, %6 : vector<32x128xf32>
    %8 = vector.broadcast %2 : vector<1x128xf32> to vector<32x128xf32>
    %9 = arith.addf %8, %7 : vector<32x128xf32>
    %10 = vector.extract_strided_slice %0 {offsets = [0, 1], sizes = [32, 1], strides = [1, 1]} : vector<32x4xf32> to vector<32x1xf32>
    %11 = vector.extract_strided_slice %1 {offsets = [1, 0], sizes = [1, 128], strides = [1, 1]} : vector<4x128xf32> to vector<1x128xf32>
    %12 = vector.broadcast %10 : vector<32x1xf32> to vector<32x128xf32>
    %13 = vector.broadcast %11 : vector<1x128xf32> to vector<32x128xf32>
    %14 = arith.mulf %12, %13 : vector<32x128xf32>
    %15 = arith.addf %9, %14 : vector<32x128xf32>
    %16 = vector.extract_strided_slice %0 {offsets = [0, 2], sizes = [32, 1], strides = [1, 1]} : vector<32x4xf32> to vector<32x1xf32>
    %17 = vector.extract_strided_slice %1 {offsets = [2, 0], sizes = [1, 128], strides = [1, 1]} : vector<4x128xf32> to vector<1x128xf32>
    %18 = vector.broadcast %16 : vector<32x1xf32> to vector<32x128xf32>
    %19 = vector.broadcast %17 : vector<1x128xf32> to vector<32x128xf32>
    %20 = arith.mulf %18, %19 : vector<32x128xf32>
    %21 = arith.addf %15, %20 : vector<32x128xf32>
    %22 = vector.extract_strided_slice %0 {offsets = [0, 3], sizes = [32, 1], strides = [1, 1]} : vector<32x4xf32> to vector<32x1xf32>
    %23 = vector.extract_strided_slice %1 {offsets = [3, 0], sizes = [1, 128], strides = [1, 1]} : vector<4x128xf32> to vector<1x128xf32>
    %24 = vector.broadcast %22 : vector<32x1xf32> to vector<32x128xf32>
    %25 = vector.broadcast %23 : vector<1x128xf32> to vector<32x128xf32>
    %26 = arith.mulf %24, %25 : vector<32x128xf32>
    %27 = arith.addf %21, %26 : vector<32x128xf32>
    %28 = math.sin %27 : vector<32x128xf32>
    %c0_5 = arith.constant 0 : index
    %c0_6 = arith.constant 0 : index
    %29 = vector.load %arg4[%c0_5, %c0_6] : memref<32x128xf32, #tpu.memory_space<vmem>>, vector<32x128xf32>
    tpu.vector_store %arg4[%c0_5, %c0_6], %28 {strides = array<i32>} : memref<32x128xf32, #tpu.memory_space<vmem>>, vector<32x128xf32>,
    return
  }
  func.func @transform_0(%arg0: i32) -> (i32, i32) {
    %c0_i32 = arith.constant 0 : i32
    %c0_i32_0 = arith.constant 0 : i32
    return %arg0, %c0_i32 : i32, i32
  }
  func.func @transform_1(%arg0: i32) -> (i32, i32) {
    %c0_i32 = arith.constant 0 : i32
    %c0_i32_0 = arith.constant 0 : i32
    %c0_i32_1 = arith.constant 0 : i32
    return %c0_i32, %c0_i32_0 : i32, i32
  }
  func.func @transform_2(%arg0: i32) -> (i32, i32) {
    %c0_i32 = arith.constant 0 : i32
    %c0_i32_0 = arith.constant 0 : i32
    %c0_i32_1 = arith.constant 0 : i32
    return %c0_i32, %c0_i32_0 : i32, i32
  }
  func.func @transform_3(%arg0: i32) -> (i32, i32) {
    %c0_i32 = arith.constant 0 : i32
    %c0_i32_0 = arith.constant 0 : i32
    return %arg0, %c0_i32 : i32, i32
  }
}

</mosaic_0001>

<bundles_post_ra>
// kernel: tpu_custom_call.1
= control target key start
LH: loop header
LB: loop body
LE: loop exit
PB: predicated region body
PF: predicated region fallthrough
CT: control target
= control target key end

     0   :  { %8 = vsyncpa [#allocation3], 0  ;;  %s1427_s0 = inlined_call_operand.vmem [shape: f32[75,4], index: 0, kind: input, shape index: {}]   ;;  %s1428_s1 = inlined_call_operand.vmem [shape: f32[4,128], index: 1, kind: input, shape index: {}]   ;;  %s1429_s2 = inlined_call_operand.vmem [shape: f32[1,128], index: 2, kind: input, shape index: {}]   ;;  %s1430_s3 = inlined_call_operand.hbm [shape: f32[75,128], index: 3, kind: output, shape index: {}]  }
   0x1   :  { %10 = vsyncpa [#allocation3 + $0x1], 0  ;;  %s1047_s12 = smov 0   ;;  %s1049_s13 = smov 0  }
   0x2   :  { %s1051_s14 = smov 0   ;;  %s1053_s15 = smov 0  }
   0x3 LB: > { %s1068_s16 = sadd.s32 4294967295, %s1012_s15   ;;  %s826_s17 = sadd.s32 4294967294, %s1012_s15   ;;  %s1012_s15 = sphi %s1053_s15, %s1440_s15   ;;  %s1008_s14 = sphi %s1051_s14, %s1439_s14   ;;  %s1004_s13 = sphi %s1049_s13, %s1438_s13   ;;  %s1000_s12 = sphi %s1047_s12, %s1437_s12  }
   0x4   : > { %s1072_s18 = sadd.s32 1, %s1012_s15   ;;  %s91_s19 = sadd.s32 1, %s1008_s14 }
   0x5   : > { %s88_s20 = ssub.s32 %s1012_s15, %s1072_s18  ;;  %p101_p0 = scmp.ne.s32.totalorder %s1008_s14, %s1004_s13 }
   0x6   : > { %p89_p1 = scmp.eq.s32.totalorder %s88_s20, 0  ;;  %p102_p2 = scmp.eq.s32.totalorder %s1068_s16, 2 }
   0x7   : > { %p107_p3 = scmp.ne.s32.totalorder %s1004_s13, %s1000_s12  ;;  %p108_p4 = scmp.eq.s32.totalorder %s826_s17, 2 }
   0x8   : > { %s1083_s21 = scalar_select %p89_p1, %s1008_s14, %s91_s19  }
   0x9   : > { %p1085_p5 = por %p102_p2, %p101_p0  ;;  %p1089_p6 = por %p108_p4, %p107_p3 }
   0xa   : > { %p829_p7 = scmp.ge.s32.totalorder %s1012_s15, 1  ;;  %p149_p8 = scmp.lt.s32.totalorder %s1012_s15, 4 }
   0xc   : > { %p150_p9 = pnand %p829_p7, %p149_p8 }
   0xd   : > { %s1096_s24 = sshll.u32 (!%p150_p9), %s1068_s16, 2  ;;  %v1014_v0 = vmov (!%p150_p9), 0   ;;  %v1015_v5 = vmov (!%p150_p9), 1   ;;  %v1016_v6 = vmov (!%p150_p9), 2   ;;  %v1017_v7 = vmov (!%p150_p9), 3   ;;  %s174_s30 = sand.u32 (!%p150_p9), 1, %s1004_s13  }
   0xe   : > { %153 = sbr.rel (%p150_p9) target bundleno = 350 (0x15e), region = 32  ;;  %927 = vset.pattern.permute.xlu1 (!%p150_p9), %v1014_v0  ;;  %926 = vset.pattern.permute.xlu0 (!%p150_p9), %v1014_v0  ;;  %p182_p10 = scmp.lt.s32.totalorder (!%p150_p9), %s1096_s24, 9  ;;  %v222_v8 = vlaneseq (!%p150_p9)  ;;  %v200_v11 = vld [vmem:[%s1428_s1] sm:$0xf] (!%p150_p9) }
   0xf   : > { %v833_v13 = vld [vmem:[%s1429_s2] ss:$0 sm:$0xff] (!%p150_p9)  ;;  %s830_s8 = sshll.u32 (!%p150_p9), %s174_s30, 5  ;;  %s1366_s10 = scalar_lea.sflag (!%p150_p9), [#allocation3], %s174_s30 }
  0x10   : > { %v223_v9 = vshrl.u32 (!%p150_p9), %v222_v8, 7  ;;  %s1320_s9 = scalar_lea.vmem (!%p150_p9), [#allocation2], %s830_s8 }
  0x12   : > { %v224_v10 = vsub.s32 (!%p150_p9), 0, %v223_v9  ;;  %v258_v20 = vsub.s32 (!%p150_p9), 1, %v223_v9  ;;  %v286_v24 = vsub.s32 (!%p150_p9), 2, %v223_v9  ;;  %v314_v31 = vsub.s32 (!%p150_p9), 3, %v223_v9 }
  0x14   : > { %v225_v12 = vrot.slane (!%p150_p9), %v200_v11, %v224_v10  ;;  %v259_v23 = vrot.slane (!%p150_p9), %v200_v11, %v258_v20  ;;  %v287_v30 = vrot.slane (!%p150_p9), %v200_v11, %v286_v24  ;;  %v1110_v37 = vrot.slane (!%p150_p9), %v200_v11, %v314_v31 }
  0x15   : > { %s183_s25 = scalar_select %p182_p10, %s1096_s24, 9 }
  0x16   : > { %s753_s11 = ssub.s32 (%p1085_p5), 10, %s1096_s24 }
  0x17   : > { %s832_s26 = sshll.u32 %s183_s25, 3  ;;  %p754_p11 = scmp.lt.s32.totalorder (%p1085_p5), %s753_s11, 4 }
  0x18   : > { %s185_s29 = scalar_lea.vmem %s1427_s0, %s832_s26 }
  0x19   : > { %v198_v1 = vld [vmem:[%s185_s29 + $0x10] sm:$0xff]  ;;  %v196_v2 = vld [vmem:[%s185_s29] sm:$0xff]  ;;  %v199_v3 = vld [vmem:[%s185_s29 + $0x18] sm:$0xff] }
  0x1a   : > { %214 = vperm.xlu1 %927, %v198_v1   ;;  %204 = vperm.xlu0 %926, %v196_v2   ;;  %v197_v4 = vld [vmem:[%s185_s29 + $0x8] sm:$0xff] }
  0x1e   : > { %219 = vperm.xlu1 %927, %v199_v3   ;;  %209 = vperm.xlu0 %926, %v197_v4  }
  0x22   : > { %929 = vset.pattern.permute.xlu1 %v1015_v5  ;;  %928 = vset.pattern.permute.xlu0 %v1015_v5 }
  0x23   : > { %245 = vperm.xlu1 %929, %v197_v4   ;;  %241 = vperm.xlu0 %928, %v196_v2  }
  0x27   : > { %249 = vperm.xlu1 %929, %v198_v1   ;;  %253 = vperm.xlu0 %928, %v199_v3  }
  0x2b   : > { %930 = vset.pattern.permute.xlu1 %v1016_v6  ;;  %931 = vset.pattern.permute.xlu0 %v1016_v6 }
  0x2c   : > { %269 = vperm.xlu1 %930, %v196_v2   ;;  %273 = vperm.xlu0 %931, %v197_v4  }
  0x30   : > { %277 = vperm.xlu1 %930, %v198_v1   ;;  %932 = vset.pattern.permute.xlu0 %v1017_v7 }
  0x31   : > { %297 = vperm.xlu0 %932, %v196_v2  }
  0x34   : > { %281 = vperm.xlu1 %930, %v199_v3  }
  0x35   : > { %309 = vperm.xlu0 %932, %v199_v3  }
  0x38   : > { %933 = vset.pattern.permute.xlu1 %v1017_v7 }
  0x39   : > { %301 = vperm.xlu1 %933, %v197_v4  }
  0x3d   : > { %305 = vperm.xlu1 %933, %v198_v1  }
  0x99   : > { %v215_v14 = vpop.permute.xlu1 %214  ;;  %v205_v15 = vpop.permute.xlu0 %204 }
  0x9a   : > { %v228_v16 = vmul.f32 %v225_v12, %v215_v14  ;;  %v226_v27 = vmul.f32 %v225_v12, %v205_v15 }
  0x9c   : > { %v238_v17 = vadd.f32 %v833_v13, %v228_v16  ;;  %v236_v32 = vadd.f32 %v833_v13, %v226_v27 }
  0x9d   : > { %v220_v18 = vpop.permute.xlu1 %219  ;;  %v210_v19 = vpop.permute.xlu0 %209 }
  0x9e   : > { %v229_v38 = vmul.f32 %v225_v12, %v220_v18  ;;  %v227_v39 = vmul.f32 %v225_v12, %v210_v19 }
  0xa0   : > { %v239_v47 = vadd.f32 %v833_v13, %v229_v38  ;;  %v237_v49 = vadd.f32 %v833_v13, %v227_v39  ;;  %v1023_v38 = vmov 1326507024  }
  0xa2   : > { %v246_v21 = vpop.permute.xlu1 %245  ;;  %v242_v22 = vpop.permute.xlu0 %241 }
  0xa3   : > { %v260_v33 = vmul.f32 %v259_v23, %v242_v22  ;;  %v261_v50 = vmul.f32 %v259_v23, %v246_v21  ;;  %v1018_v21 = vmov 683565275  }
  0xa5   : > { %v264_v40 = vadd.f32 %v260_v33, %v236_v32  ;;  %v265_v61 = vadd.f32 %v261_v50, %v237_v49 }
  0xa6   : > { %v250_v25 = vpop.permute.xlu1 %249  ;;  %v254_v26 = vpop.permute.xlu0 %253 }
  0xa7   : > { %v262_v28 = vmul.f32 %v259_v23, %v250_v25  ;;  %v263_v42 = vmul.f32 %v259_v23, %v254_v26  ;;  %v1019_v23 = vmov 2475754826   ;;  %v1020_v26 = vmov 2131351028  }
  0xa9   : > { %v266_v29 = vadd.f32 %v262_v28, %v238_v17  ;;  %v267_v53 = vadd.f32 %v263_v42, %v239_v47  ;;  %v1021_v28 = vmov 2102212464  }
  0xab   : > { %v270_v34 = vpop.permute.xlu1 %269  ;;  %v274_v35 = vpop.permute.xlu0 %273 }
  0xac   : > { %v288_v36 = vmul.f32 %v287_v30, %v270_v34  ;;  %v289_v56 = vmul.f32 %v287_v30, %v274_v35 }
  0xae   : > { %v292_v45 = vadd.f32 %v288_v36, %v264_v40  ;;  %v293_v2 = vadd.f32 %v289_v56, %v265_v61 }
  0xaf   : > { %v278_v41 = vpop.permute.xlu1 %277 }
  0xb0   : > { %v290_v43 = vmul.f32 %v287_v30, %v278_v41  ;;  %v298_v44 = vpop.permute.xlu0 %297 }
  0xb1   : > { %v316_v46 = vmul.f32 %v1110_v37, %v298_v44 }
  0xb2   : > { %v1113_v48 = vadd.f32 %v290_v43, %v266_v29 }
  0xb3   : > { %v1115_v51 = vadd.f32 %v316_v46, %v292_v45  ;;  %v282_v52 = vpop.permute.xlu1 %281 }
  0xb4   : > { %v291_v54 = vmul.f32 %v287_v30, %v282_v52  ;;  %v310_v55 = vpop.permute.xlu0 %309  ;;  %v1022_v30 = vmov 920167782  }
  0xb5   : > { %v324_v57 = vand.u32 2147483647, %v1115_v51  ;;  %v327_v58 = vand.u32 2139095040, %v1115_v51  ;;  %v319_v60 = vmul.f32 %v1110_v37, %v310_v55  ;;  %vm326_vm13 = vcmp.lt.s32.totalorder %v1115_v51, 0 }
  0xb6   : > { %v295_v59 = vadd.f32 %v291_v54, %v267_v53 }
  0xb7   : > { %v328_v62 = vshrl.u32 %v327_v58, 23  ;;  %v331_v63 = vand.u32 8388607, %v324_v57  ;;  %vm1224_vm14 = vcmp.le.f32.partialorder %v324_v57, 0.7853982 }
  0xb8   : > { %v1122_v0 = vadd.f32 %v319_v60, %v295_v59  ;;  %v302_v1 = vpop.permute.xlu1 %301 }
  0xb9   : > { %v834_v3 = vadd.s32 4294967169, %v328_v62  ;;  %v317_v4 = vmul.f32 %v1110_v37, %v302_v1  ;;  %v332_v9 = vor.u32 8388608, %v331_v63 }
  0xba   : > { %v636_v5 = vand.u32 2147483647, %v1122_v0  ;;  %v639_v6 = vand.u32 2139095040, %v1122_v0 }
  0xbb   : > { %v334_v7 = vadd.s32 1, %v834_v3  ;;  %v1127_v8 = vadd.f32 %v317_v4, %v293_v2  ;;  %v1132_v17 = vshll.u32 %v332_v9, 8 }
  0xbc   : > { %v640_v10 = vshrl.u32 %v639_v6, 23  ;;  %v643_v11 = vand.u32 8388607, %v636_v5  ;;  %v306_v61 = vpop.permute.xlu1 %305 }
  0xbd   : > { %vm335_vm0 = vcmp.gt.s32.totalorder %v334_v7, 0  ;;  %v431_v12 = vand.u32 2139095040, %v1127_v8 }
  0xbe   : > { %v336_v13 = vsel %vm335_vm0, %v334_v7, 0  ;;  %v846_v14 = vadd.s32 4294967169, %v640_v10  ;;  %v644_v18 = vor.u32 8388608, %v643_v11  ;;  %v318_v11 = vmul.f32 %v1110_v37, %v306_v61 }
  0xbf   : > { %v337_v15 = vshrl.u32 %v336_v13, 5  ;;  %v338_v16 = vand.u32 31, %v336_v13  ;;  %v432_v19 = vshrl.u32 %v431_v12, 23 }
  0xc0   : > { %v646_v25 = vadd.s32 1, %v846_v14  ;;  %v1154_v1 = vshll.u32 %v644_v18, 8 }
  0xc1   : > { %v339_v20 = vsub.s32 32, %v338_v16  ;;  %v341_v22 = vshll.u32 %v1018_v21, %v338_v16  ;;  %v344_v24 = vshll.u32 %v1019_v23, %v338_v16  ;;  %v347_v27 = vshll.u32 %v1020_v26, %v338_v16 }
  0xc2   : > { %v350_v29 = vshll.u32 %v1021_v28, %v338_v16  ;;  %v353_v31 = vshll.u32 %v1022_v30, %v338_v16  ;;  %vm356_vm1 = vcmp.lt.s32.totalorder %v337_v15, 1  ;;  %vm357_vm2 = vcmp.lt.s32.totalorder %v337_v15, 2 }
  0xc3   : > { %v342_v32 = vshrl.u32 %v1019_v23, %v339_v20  ;;  %v345_v33 = vshrl.u32 %v1020_v26, %v339_v20  ;;  %v348_v34 = vshrl.u32 %v1021_v28, %v339_v20  ;;  %v340_v35 = vshrl.u32 %v1018_v21, %v339_v20 }
  0xc4   : > { %v351_v36 = vshrl.u32 %v1022_v30, %v339_v20  ;;  %v354_v39 = vshrl.u32 %v1023_v38, %v339_v20  ;;  %vm358_vm3 = vcmp.lt.s32.totalorder %v337_v15, 3  ;;  %vm647_vm4 = vcmp.gt.s32.totalorder %v646_v25, 0 }
  0xc5   : > { %v343_v40 = vor.u32 %v342_v32, %v341_v22  ;;  %v346_v41 = vor.u32 %v345_v33, %v344_v24  ;;  %v349_v42 = vor.u32 %v348_v34, %v347_v27  ;;  %vm359_vm5 = vcmp.lt.s32.totalorder %v337_v15, 4 }
  0xc6   : > { %v352_v43 = vor.u32 %v351_v36, %v350_v29  ;;  %v355_v44 = vor.u32 %v354_v39, %v353_v31  ;;  %v648_v45 = vsel %vm647_vm4, %v646_v25, 0  ;;  %v838_v10 = vadd.s32 4294967169, %v432_v19 }
  0xc7   : > { %v360_v46 = vsel %vm356_vm1, %v340_v35, %v343_v40  ;;  %v361_v47 = vsel %vm359_vm5, %v349_v42, 2102212464  ;;  %v364_v49 = vsel %vm356_vm1, %v343_v40, %v346_v41  ;;  %v368_v50 = vsel %vm356_vm1, %v346_v41, %v349_v42 }
  0xc8   : > { %v362_v52 = vsel %vm358_vm3, %v346_v41, %v361_v47  ;;  %v365_v53 = vsel %vm359_vm5, %v352_v43, 920167782  ;;  %v369_v54 = vsel %vm359_vm5, %v355_v44, 1326507024  ;;  %v649_v55 = vshrl.u32 %v648_v45, 5 }
  0xc9   : > { %v363_v56 = vsel %vm357_vm2, %v360_v46, %v362_v52  ;;  %v366_v58 = vsel %vm358_vm3, %v349_v42, %v365_v53  ;;  %v370_v59 = vsel %vm358_vm3, %v352_v43, %v369_v54  ;;  %v650_v60 = vand.u32 31, %v648_v45 }
  0xca   : > { %v367_v62 = vsel %vm357_vm2, %v364_v49, %v366_v58  ;;  %v371_v63 = vsel %vm357_vm2, %v368_v50, %v370_v59  ;;  %v379_v7 = vmul.u32 %v1132_v17, %v363_v56  ;;  %vm668_vm6 = vcmp.lt.s32.totalorder %v649_v55, 1 }
  0xcb   : > { %v1157_v2 = vmul.u32.u64.low %v1132_v17, %v371_v63  ;;  %v1158_v3 = vmul.u32.u64.high %v1132_v17, %v371_v63, %v1157_v2  ;;  %v1161_v4 = vmul.u32.u64.low %v1132_v17, %v367_v62  ;;  %v1162_v6 = vmul.u32.u64.high %v1132_v17, %v367_v62, %v1161_v4 }
  0xcc   : > { %v651_v9 = vsub.s32 32, %v650_v60  ;;  %v653_v12 = vshll.u32 %v1018_v21, %v650_v60  ;;  %v656_v13 = vshll.u32 %v1019_v23, %v650_v60  ;;  %v659_v14 = vshll.u32 %v1020_v26, %v650_v60 }
  0xcd   : > { %v662_v20 = vshll.u32 %v1021_v28, %v650_v60  ;;  %vm381_vm7 = vc.u32 %v1158_v3, %v1161_v4  ;;  %v382_v37 = vadd.s32 1, %v1162_v6  ;;  %v665_v19 = vshll.u32 %v1022_v30, %v650_v60 }
  0xce   : > { %v654_v15 = vshrl.u32 %v1019_v23, %v651_v9  ;;  %v657_v16 = vshrl.u32 %v1020_v26, %v651_v9  ;;  %v660_v18 = vshrl.u32 %v1021_v28, %v651_v9  ;;  %v663_v17 = vshrl.u32 %v1022_v30, %v651_v9 }
  0xcf   : > { %v666_v27 = vshrl.u32 %v1023_v38, %v651_v9  ;;  %v383_v29 = vsel %vm381_vm7, %v382_v37, %v1162_v6  ;;  %vm669_vm8 = vcmp.lt.s32.totalorder %v649_v55, 2  ;;  %vm671_vm9 = vcmp.lt.s32.totalorder %v649_v55, 4 }
  0xd0   : > { %v655_v22 = vor.u32 %v654_v15, %v653_v12  ;;  %v658_v24 = vor.u32 %v657_v16, %v656_v13  ;;  %v661_v25 = vor.u32 %v660_v18, %v659_v14  ;;  %v664_v31 = vor.u32 %v663_v17, %v662_v20 }
  0xd1   : > { %v384_v32 = vadd.s32 %v383_v29, %v379_v7  ;;  %v652_v33 = vshrl.u32 %v1018_v21, %v651_v9  ;;  %v667_v34 = vor.u32 %v666_v27, %v665_v19  ;;  %vm670_vm10 = vcmp.lt.s32.totalorder %v649_v55, 3 }
  0xd2   : > { %v673_v35 = vsel %vm671_vm9, %v661_v25, 2102212464  ;;  %v676_v36 = vsel %vm668_vm6, %v655_v22, %v658_v24  ;;  %v677_v39 = vsel %vm671_vm9, %v664_v31, 920167782  ;;  %v680_v40 = vsel %vm668_vm6, %v658_v24, %v661_v25 }
  0xd3   : > { %v385_v41 = vadd.s32 536870912, %v384_v32  ;;  %v672_v42 = vsel %vm668_vm6, %v652_v33, %v655_v22  ;;  %v678_v43 = vsel %vm670_vm10, %v661_v25, %v677_v39  ;;  %v681_v44 = vsel %vm671_vm9, %v667_v34, 1326507024 }
  0xd4   : > { %v674_v45 = vsel %vm670_vm10, %v658_v24, %v673_v35  ;;  %v679_v46 = vsel %vm669_vm8, %v676_v36, %v678_v43  ;;  %v682_v47 = vsel %vm670_vm10, %v664_v31, %v681_v44  ;;  %v438_v49 = vadd.s32 1, %v838_v10 }
  0xd5   : > { %v386_v50 = vshrl.u32 %v385_v41, 30  ;;  %v683_v52 = vsel %vm669_vm8, %v680_v40, %v682_v47  ;;  %v1188_v53 = vmul.u32.u64.low %v1154_v1, %v679_v46  ;;  %v1189_v54 = vmul.u32.u64.high %v1154_v1, %v679_v46, %v1188_v53 }
  0xd6   : > { %v1193_v56 = vmul.u32.u64.low %v1154_v1, %v683_v52  ;;  %v1194_v58 = vmul.u32.u64.high %v1154_v1, %v683_v52, %v1193_v56  ;;  %vm439_vm11 = vcmp.gt.s32.totalorder %v438_v49, 0  ;;  %v675_v60 = vsel %vm669_vm8, %v672_v42, %v674_v45 }
  0xd7   : > { %v387_v59 = vshll.u32 %v386_v50, 30  ;;  %v440_v61 = vsel %vm439_vm11, %v438_v49, 0  ;;  %v1198_v62 = vadd.f32 %v318_v11, %v1113_v48  ;;  %v694_v6 = vadd.s32 1, %v1189_v54 }
  0xd8   : > { %v442_v63 = vand.u32 31, %v440_v61  ;;  %v428_v7 = vand.u32 2147483647, %v1127_v8  ;;  %v691_v9 = vmul.u32 %v1154_v1, %v675_v60  ;;  %vm693_vm12 = vc.u32 %v1194_v58, %v1188_v53 }
  0xd9   : > { %v388_v2 = vsub.s32 %v384_v32, %v387_v59  ;;  %v695_v55 = vsel %vm693_vm12, %v694_v6, %v1189_v54  ;;  %v380_v14 = vadd.s32 %v1161_v4, %v1158_v3  ;;  %v410_v20 = vsub.s32 4, %v386_v50 }
  0xda   : > { %v443_v10 = vsub.s32 32, %v442_v63  ;;  %v696_v13 = vadd.s32 %v695_v55, %v691_v9  ;;  %v435_v11 = vand.u32 8388607, %v428_v7  ;;  %v441_v37 = vshrl.u32 %v440_v61, 5 }
  0xdb   : > { %v390_v12 = vsub.s32 0, %v388_v2  ;;  %v445_v22 = vshll.u32 %v1018_v21, %v442_v63  ;;  %v448_v24 = vshll.u32 %v1019_v23, %v442_v63  ;;  %v451_v3 = vshll.u32 %v1020_v26, %v442_v63 }
  0xdc   : > { %v697_v15 = vadd.s32 536870912, %v696_v13  ;;  %v446_v1 = vshrl.u32 %v1019_v23, %v443_v10  ;;  %v449_v16 = vshrl.u32 %v1020_v26, %v443_v10  ;;  %v452_v17 = vshrl.u32 %v1021_v28, %v443_v10 }
  0xdd   : > { %v835_v48 = vmin.u32 %v390_v12, %v388_v2  ;;  %v455_v25 = vshrl.u32 %v1022_v30, %v443_v10  ;;  %v454_v4 = vshll.u32 %v1021_v28, %v442_v63  ;;  %v458_v29 = vshrl.u32 %v1023_v38, %v443_v10 }
  0xde   : > { %v1214_v19 = vshrl.u32 %v697_v15, 30  ;;  %v436_v33 = vor.u32 8388608, %v435_v11  ;;  %v447_v34 = vor.u32 %v446_v1, %v445_v22  ;;  %v450_v35 = vor.u32 %v449_v16, %v448_v24 }
  0xdf   : > { %v392_v18 = vclz %v835_v48  ;;  %v453_v36 = vor.u32 %v452_v17, %v451_v3  ;;  %v456_v39 = vor.u32 %v455_v25, %v454_v4  ;;  %v457_v40 = vshll.u32 %v1022_v30, %v442_v63 }
  0xe0   : > { %v699_v32 = vshll.u32 %v1214_v19, 30  ;;  %v411_v42 = vsel %vm326_vm13, %v410_v20, %v386_v50  ;;  %vm460_vm0 = vcmp.lt.s32.totalorder %v441_v37, 1  ;;  %vm462_vm1 = vcmp.lt.s32.totalorder %v441_v37, 3 }
  0xe1   : > { %v836_v27 = vadd.s32 4294967294, %v392_v18  ;;  %v459_v45 = vor.u32 %v458_v29, %v457_v40  ;;  %vm463_vm2 = vcmp.lt.s32.totalorder %v441_v37, 4  ;;  %v468_v49 = vsel %vm460_vm0, %v447_v34, %v450_v35 }
  0xe2   : > { %v1232_v43 = vsub.s32 %v696_v13, %v699_v32  ;;  %vm638_vm3 = vcmp.lt.s32.totalorder %v1122_v0, 0  ;;  %v465_v56 = vsel %vm463_vm2, %v453_v36, 2102212464  ;;  %v469_v50 = vsel %vm463_vm2, %v456_v39, 920167782 }
  0xe3   : > { %vm837_vm15 = vcmp.lt.s32.totalorder %v836_v27, 0  ;;  %v444_v60 = vshrl.u32 %v1018_v21, %v443_v10  ;;  %vm461_vm4 = vcmp.lt.s32.totalorder %v441_v37, 2  ;;  %v470_v61 = vsel %vm462_vm1, %v453_v36, %v469_v50 }
  0xe4   : > { %v395_v41 = vsel %vm837_vm15, 0, %v836_v27  ;;  %v702_v47 = vsub.s32 0, %v1232_v43  ;;  %v471_v6 = vsel %vm461_vm4, %v468_v49, %v470_v61  ;;  %v476_v9 = vshll.u32 %v436_v33, 8 }
  0xe5   : > { %v396_v57 = vsub.s32 32, %v395_v41  ;;  %v400_v44 = vsub.s32 4294967266, %v395_v41  ;;  %v397_v46 = vshll.u32 %v388_v2, %v395_v41  ;;  %v464_v55 = vsel %vm460_vm0, %v444_v60, %v447_v34 }
  0xe6   : > { %v847_v59 = vmin.u32 %v702_v47, %v1232_v43  ;;  %v466_v13 = vsel %vm462_vm1, %v450_v35, %v465_v56  ;;  %v472_v48 = vsel %vm460_vm0, %v450_v35, %v453_v36  ;;  %v722_v10 = vsub.s32 4, %v1214_v19 }
  0xe7   : > { %v398_v52 = vshrl.u32 %v380_v14, %v396_v57  ;;  %v401_v54 = vadd.s32 127, %v400_v44  ;;  %v413_v14 = vsel %vm1224_vm14, 0, %v411_v42  ;;  %v473_v15 = vsel %vm463_vm2, %v459_v45, 1326507024 }
  0xe8   : > { %v704_v12 = vclz %v847_v59  ;;  %v474_v16 = vsel %vm462_vm1, %v456_v39, %v473_v15  ;;  %v1251_v18 = vmul.u32.u64.low %v476_v9, %v471_v6  ;;  %v1252_v20 = vmul.u32.u64.high %v476_v9, %v471_v6, %v1251_v18 }
  0xe9   : > { %v399_v63 = vor.u32 %v398_v52, %v397_v46  ;;  %v402_v2 = vshll.u32 %v401_v54, 23  ;;  %v467_v24 = vsel %vm461_vm4, %v464_v55, %v466_v13  ;;  %v475_v25 = vsel %vm461_vm4, %v472_v48, %v474_v16 }
  0xea   : > { %v848_v1 = vadd.s32 4294967294, %v704_v12  ;;  %v1257_v27 = vmul.u32.u64.low %v476_v9, %v475_v25  ;;  %v1258_v3 = vmul.u32.u64.high %v476_v9, %v475_v25, %v1257_v27  ;;  %v535_v4 = vand.u32 2139095040, %v1198_v62 }
  0xeb   : > { %v403_v11 = vor.u32 4788187, %v402_v2  ;;  %v406_v22 = vcvt.s32.f32 %v399_v63  ;;  %vm1263_vm6 = vcmp.le.f32.partialorder %v636_v5, 0.7853982  ;;  %v692_v33 = vadd.s32 %v1188_v53, %v1194_v58 }
  0xec   : > { %vm849_vm5 = vcmp.lt.s32.totalorder %v848_v1, 0  ;;  %v723_v36 = vsel %vm638_vm3, %v722_v10, %v1214_v19  ;;  %v486_v39 = vadd.s32 1, %v1252_v20  ;;  %v417_v41 = vadd.s32 3, %v413_v14 }
  0xed   : > { %v404_v17 = vand.u32 2147483647, %v403_v11  ;;  %v707_v34 = vsel %vm849_vm5, 0, %v848_v1  ;;  %v483_v42 = vmul.u32 %v476_v9, %v467_v24  ;;  %v536_v57 = vshrl.u32 %v535_v4, 23 }
  0xee   : > { %v708_v35 = vsub.s32 32, %v707_v34  ;;  %v712_v37 = vsub.s32 4294967266, %v707_v34  ;;  %v709_v5 = vshll.u32 %v1232_v43, %v707_v34  ;;  %vm485_vm7 = vc.u32 %v1258_v3, %v1251_v18 }
  0xef   : > { %v407_v29 = vmul.f32 %v406_v22, %v404_v17  ;;  %v725_v58 = vsel %vm1263_vm6, 0, %v723_v36  ;;  %v487_v19 = vsel %vm485_vm7, %v486_v39, %v1252_v20  ;;  %v842_v46 = vadd.s32 4294967169, %v536_v57 }
  0xf0   : > { %v710_v44 = vshrl.u32 %v692_v33, %v708_v35  ;;  %v713_v45 = vadd.s32 127, %v712_v37  ;;  %v488_v52 = vadd.s32 %v487_v19, %v483_v42  ;;  %v418_v59 = vand.u32 3, %v417_v41 }
  0xf1   : > { %v408_v40 = vxor.u32 2147483648, %v407_v29  ;;  %v542_v54 = vadd.s32 1, %v842_v46  ;;  %v729_v60 = vadd.s32 3, %v725_v58  ;;  %v532_v61 = vand.u32 2147483647, %v1198_v62 }
  0xf2   : > { %v711_v49 = vor.u32 %v710_v44, %v709_v5  ;;  %v714_v43 = vshll.u32 %v713_v45, 23  ;;  %v489_v50 = vadd.s32 536870912, %v488_v52  ;;  %vm419_vm9 = vcmp.lt.s32.totalorder %v418_v59, 2 }
  0xf3   : > { %v409_v53 = vsel %vm326_vm13, %v408_v40, %v407_v29  ;;  %vm543_vm8 = vcmp.gt.s32.totalorder %v542_v54, 0  ;;  %vm420_vm10 = vcmp.eq.s32.totalorder %v418_v59, 0  ;;  %vm423_vm11 = vcmp.eq.s32.totalorder %v418_v59, 2 }
  0xf4   : > { %v412_v47 = vsel %vm1224_vm14, %v1115_v51, %v409_v53  ;;  %v715_v56 = vor.u32 4788187, %v714_v43  ;;  %v718_v2 = vcvt.s32.f32 %v711_v49  ;;  %v1285_v6 = vshrl.u32 %v489_v50, 30 }
  0xf5   : > { %934 = vcosq.f32 %v412_v47  ;;  %v544_v9 = vsel %vm543_vm8, %v542_v54, 0  ;;  %vm416_vm12 = vweird.f32 %v1115_v51  ;;  %v1289_v11 = vand.u32 3, %v729_v60 }
  0xf6   : > { %936 = vsinq.f32 %v412_v47  ;;  %v716_v63 = vand.u32 2147483647, %v715_v56  ;;  %v546_v31 = vand.u32 31, %v544_v9  ;;  %v491_v55 = vshll.u32 %v1285_v6, 30 }
  0xf7   : > { %v539_v10 = vand.u32 8388607, %v532_v61  ;;  %v545_v36 = vshrl.u32 %v544_v9, 5  ;;  %v484_v51 = vadd.s32 %v1251_v18, %v1258_v3  ;;  %vm735_vm2 = vcmp.eq.s32.totalorder %v1289_v11, 2 }
  0xf8   : > { %v719_v12 = vmul.f32 %v718_v2, %v716_v63  ;;  %v547_v13 = vsub.s32 32, %v546_v31  ;;  %v1291_v14 = vsub.s32 %v488_v52, %v491_v55  ;;  %v549_v15 = vshll.u32 %v1018_v21, %v546_v31 }
  0xf9   : > { %v552_v16 = vshll.u32 %v1019_v23, %v546_v31  ;;  %v555_v24 = vshll.u32 %v1020_v26, %v546_v31  ;;  %v558_v40 = vshll.u32 %v1021_v28, %v546_v31  ;;  %v540_v42 = vor.u32 8388608, %v539_v10 }
  0xfa   : > { %v720_v48 = vxor.u32 2147483648, %v719_v12  ;;  %v550_v1 = vshrl.u32 %v1019_v23, %v547_v13  ;;  %v553_v20 = vshrl.u32 %v1020_v26, %v547_v13  ;;  %v494_v22 = vsub.s32 0, %v1291_v14 }
  0xfb   : > { %v556_v25 = vshrl.u32 %v1021_v28, %v547_v13  ;;  %v559_v23 = vshrl.u32 %v1022_v30, %v547_v13  ;;  %v548_v57 = vshrl.u32 %v1018_v21, %v547_v13  ;;  %v561_v45 = vshll.u32 %v1022_v30, %v546_v31 }
  0xfc   : > { %v721_v17 = vsel %vm638_vm3, %v720_v48, %v719_v12  ;;  %v551_v29 = vor.u32 %v550_v1, %v549_v15  ;;  %v554_v33 = vor.u32 %v553_v20, %v552_v16  ;;  %v839_v37 = vmin.u32 %v494_v22, %v1291_v14 }
  0xfd   : > { %v724_v4 = vsel %vm1263_vm6, %v1122_v0, %v721_v17  ;;  %v557_v39 = vor.u32 %v556_v25, %v555_v24  ;;  %v560_v44 = vor.u32 %v559_v23, %v558_v40  ;;  %v562_v53 = vshrl.u32 %v1023_v38, %v547_v13 }
  0xfe   : > { %938 = vcosq.f32 %v724_v4  ;;  %v496_v41 = vclz %v839_v37  ;;  %vm564_vm13 = vcmp.lt.s32.totalorder %v545_v36, 1  ;;  %vm565_vm14 = vcmp.lt.s32.totalorder %v545_v36, 2 }
  0xff   : > { %v935_v27 = vpop.eup %934  ;;  %940 = vsinq.f32 %v724_v4  ;;  %v563_v46 = vor.u32 %v562_v53, %v561_v45  ;;  %vm566_vm15 = vcmp.lt.s32.totalorder %v545_v36, 3  ;;  %vm567_vm0 = vcmp.lt.s32.totalorder %v545_v36, 4 }
 0x100   : > { %v937_v34 = vpop.eup %936  ;;  %v424_v35 = vxor.u32 2147483648, %v935_v27  ;;  %v840_v19 = vadd.s32 4294967294, %v496_v41  ;;  %v568_v21 = vsel %vm564_vm13, %v548_v57, %v551_v29  ;;  %v569_v30 = vsel %vm567_vm0, %v557_v39, 2102212464 }
 0x101   : > { %v421_v26 = vxor.u32 2147483648, %v937_v34  ;;  %v572_v38 = vsel %vm564_vm13, %v551_v29, %v554_v33  ;;  %v570_v49 = vsel %vm566_vm15, %v554_v33, %v569_v30  ;;  %v573_v43 = vsel %vm567_vm0, %v560_v44, 920167782 }
 0x102   : > { %v425_v32 = vsel %vm423_vm11, %v424_v35, %v937_v34  ;;  %vm841_vm1 = vcmp.lt.s32.totalorder %v840_v19, 0  ;;  %v576_v52 = vsel %vm564_vm13, %v554_v33, %v557_v39  ;;  %v571_v50 = vsel %vm565_vm14, %v568_v21, %v570_v49 }
 0x103   : > { %v422_v5 = vsel %vm420_vm10, %v935_v27, %v421_v26  ;;  %v499_v47 = vsel %vm841_vm1, 0, %v840_v19  ;;  %v574_v60 = vsel %vm566_vm15, %v557_v39, %v573_v43  ;;  %v577_v63 = vsel %vm567_vm0, %v563_v46, 1326507024 }
 0x104   : > { %v426_v58 = vsel %vm419_vm9, %v422_v5, %v425_v32  ;;  %v500_v54 = vsub.s32 32, %v499_v47  ;;  %v504_v56 = vsub.s32 4294967266, %v499_v47  ;;  %v501_v59 = vshll.u32 %v1291_v14, %v499_v47 }
 0x105   : > { %v427_v28 = vsel %vm416_vm12, nan, %v426_v58  ;;  %v580_v2 = vshll.u32 %v540_v42, 8  ;;  %v575_v55 = vsel %vm565_vm14, %v572_v38, %v574_v60  ;;  %v578_v13 = vsel %vm566_vm15, %v560_v44, %v577_v63 }
 0x106   : > { %740 = vst [vmem:[%s1320_s9] sm:$0xff] %v427_v28  ;;  %v502_v31 = vshrl.u32 %v484_v51, %v500_v54  ;;  %v505_v12 = vadd.s32 127, %v504_v56  ;;  %v579_v3 = vsel %vm565_vm14, %v576_v52, %v578_v13  ;;  %vm732_vm3 = vcmp.eq.s32.totalorder %v1289_v11, 0 }
 0x107   : > { %v1335_v10 = vmul.u32.u64.low %v580_v2, %v575_v55  ;;  %v1336_v15 = vmul.u32.u64.high %v580_v2, %v575_v55, %v1335_v10  ;;  %v1340_v17 = vmul.u32.u64.low %v580_v2, %v579_v3  ;;  %v1341_v22 = vmul.u32.u64.high %v580_v2, %v579_v3, %v1340_v17 }
 0x108   : > { %v939_v9 = vpop.eup %938  ;;  %v503_v1 = vor.u32 %v502_v31, %v501_v59  ;;  %v506_v16 = vshll.u32 %v505_v12, 23  ;;  %vm731_vm4 = vcmp.lt.s32.totalorder %v1289_v11, 2  ;;  %vm728_vm5 = vweird.f32 %v1122_v0 }
 0x109   : > { %v941_v48 = vpop.eup %940  ;;  %v736_v18 = vxor.u32 2147483648, %v939_v9  ;;  %v590_v4 = vadd.s32 1, %v1336_v15  ;;  %v587_v34 = vmul.u32 %v580_v2, %v571_v50  ;;  %v588_v35 = vadd.s32 %v1335_v10, %v1341_v22 }
 0x10a   : > { %v733_v14 = vxor.u32 2147483648, %v941_v48  ;;  %v507_v25 = vor.u32 4788187, %v506_v16  ;;  %v510_v23 = vcvt.s32.f32 %v503_v1  ;;  %vm589_vm6 = vc.u32 %v1341_v22, %v1335_v10 }
 0x10b   : > { %v737_v20 = vsel %vm735_vm2, %v736_v18, %v941_v48  ;;  %v514_v36 = vsub.s32 4, %v1285_v6  ;;  %v591_v11 = vsel %vm589_vm6, %v590_v4, %v1336_v15  ;;  %vm430_vm7 = vcmp.lt.s32.totalorder %v1127_v8, 0 }
 0x10c   : > { %v734_v24 = vsel %vm732_vm3, %v939_v9, %v733_v14  ;;  %v508_v33 = vand.u32 2147483647, %v507_v25  ;;  %v592_v26 = vadd.s32 %v591_v11, %v587_v34  ;;  %vm429_vm8 = vcmp.le.f32.partialorder %v428_v7, 0.7853982 }
 0x10d   : > { %v738_v27 = vsel %vm731_vm4, %v734_v24, %v737_v20  ;;  %v515_v32 = vsel %vm430_vm7, %v514_v36, %v1285_v6  ;;  %vm520_vm13 = vweird.f32 %v1127_v8  ;;  %vm534_vm14 = vcmp.lt.s32.totalorder %v1198_v62, 0 }
 0x10e   : > { %v739_v29 = vsel %vm728_vm5, nan, %v738_v27  ;;  %v511_v37 = vmul.f32 %v510_v23, %v508_v33  ;;  %v593_v0 = vadd.s32 536870912, %v592_v26  ;;  %v517_v57 = vsel %vm429_vm8, 0, %v515_v32 }
 0x10f   : > { %743 = vst [vmem:[%s1320_s9 + $0x18] sm:$0xff] %v739_v29  ;;  %v521_v45 = vadd.s32 3, %v517_v57  ;;  %vm533_vm15 = vcmp.le.f32.partialorder %v532_v61, 0.7853982  ;;  %vm624_vm3 = vweird.f32 %v1198_v62 }
 0x110   : > { %v512_v39 = vxor.u32 2147483648, %v511_v37  ;;  %v594_v42 = vshrl.u32 %v593_v0, 30 }
 0x111   : > { %v522_v19 = vand.u32 3, %v521_v45 }
 0x112   : > { %v513_v40 = vsel %vm430_vm7, %v512_v39, %v511_v37  ;;  %v595_v5 = vshll.u32 %v594_v42, 30  ;;  %v618_v55 = vsub.s32 4, %v594_v42 }
 0x113   : > { %v516_v41 = vsel %vm429_vm8, %v1127_v8, %v513_v40  ;;  %vm527_vm9 = vcmp.eq.s32.totalorder %v522_v19, 2  ;;  %vm524_vm10 = vcmp.eq.s32.totalorder %v522_v19, 0  ;;  %vm523_vm12 = vcmp.lt.s32.totalorder %v522_v19, 2 }
 0x114   : > { %942 = vcosq.f32 %v516_v41  ;;  %v596_v44 = vsub.s32 %v592_v26, %v595_v5  ;;  %v619_v48 = vsel %vm534_vm14, %v618_v55, %v594_v42 }
 0x115   : > { %944 = vsinq.f32 %v516_v41  ;;  %v621_v3 = vsel %vm533_vm15, 0, %v619_v48 }
 0x116   : > { %v598_v53 = vsub.s32 0, %v596_v44  ;;  %v625_v10 = vadd.s32 3, %v621_v3 }
 0x118   : > { %v843_v58 = vmin.u32 %v598_v53, %v596_v44  ;;  %v626_v15 = vand.u32 3, %v625_v10 }
 0x11a   : > { %v600_v28 = vclz %v843_v58  ;;  %vm631_vm0 = vcmp.eq.s32.totalorder %v626_v15, 2  ;;  %vm628_vm1 = vcmp.eq.s32.totalorder %v626_v15, 0  ;;  %vm627_vm2 = vcmp.lt.s32.totalorder %v626_v15, 2 }
 0x11c   : > { %v844_v30 = vadd.s32 4294967294, %v600_v28 }
 0x11e   : > { %v943_v46 = vpop.eup %942  ;;  %vm845_vm11 = vcmp.lt.s32.totalorder %v844_v30, 0 }
 0x11f   : > { %v945_v21 = vpop.eup %944  ;;  %v528_v7 = vxor.u32 2147483648, %v943_v46  ;;  %v603_v49 = vsel %vm845_vm11, 0, %v844_v30 }
 0x120   : > { %v525_v38 = vxor.u32 2147483648, %v945_v21  ;;  %v604_v52 = vsub.s32 32, %v603_v49  ;;  %v608_v51 = vsub.s32 4294967266, %v603_v49  ;;  %v605_v56 = vshll.u32 %v596_v44, %v603_v49 }
 0x121   : > { %v529_v6 = vsel %vm527_vm9, %v528_v7, %v945_v21 }
 0x122   : > { %v526_v47 = vsel %vm524_vm10, %v943_v46, %v525_v38  ;;  %v606_v50 = vshrl.u32 %v588_v35, %v604_v52  ;;  %v609_v59 = vadd.s32 127, %v608_v51 }
 0x123   : > { %v530_v43 = vsel %vm523_vm12, %v526_v47, %v529_v6 }
 0x124   : > { %v531_v54 = vsel %vm520_vm13, nan, %v530_v43  ;;  %v607_v60 = vor.u32 %v606_v50, %v605_v56  ;;  %v610_v63 = vshll.u32 %v609_v59, 23 }
 0x125   : > { %741 = vst [vmem:[%s1320_s9 + $0x8] sm:$0xff] %v531_v54 }
 0x126   : > { %v611_v2 = vor.u32 4788187, %v610_v63  ;;  %v614_v31 = vcvt.s32.f32 %v607_v60 }
 0x128   : > { %v612_v9 = vand.u32 2147483647, %v611_v2 }
 0x12a   : > { %v615_v12 = vmul.f32 %v614_v31, %v612_v9 }
 0x12c   : > { %v616_v13 = vxor.u32 2147483648, %v615_v12 }
 0x12e   : > { %v617_v8 = vsel %vm534_vm14, %v616_v13, %v615_v12 }
 0x12f   : > { %v620_v18 = vsel %vm533_vm15, %v1198_v62, %v617_v8 }
 0x130   : > { %946 = vcosq.f32 %v620_v18 }
 0x131   : > { %948 = vsinq.f32 %v620_v18 }
 0x13a   : > { %v947_v14 = vpop.eup %946 }
 0x13b   : > { %v949_v1 = vpop.eup %948  ;;  %v632_v16 = vxor.u32 2147483648, %v947_v14  ;;  %751 = sbr.rel (!%p1085_p5) target bundleno = 350 (0x15e), region = 36 }
 0x13c   : > { %v629_v20 = vxor.u32 2147483648, %v949_v1 }
 0x13d   : > { %v633_v17 = vsel %vm631_vm0, %v632_v16, %v949_v1 }
 0x13e   : > { %v630_v61 = vsel %vm628_vm1, %v947_v14, %v629_v20 }
 0x13f   : > { %v634_v22 = vsel %vm627_vm2, %v630_v61, %v633_v17 }
 0x140   : > { %v635_v24 = vsel %vm624_vm3, nan, %v634_v22 }
 0x141   : > { %742 = vst [vmem:[%s1320_s9 + $0x10] sm:$0xff] %v635_v24 }
 0x142   : > { %s1442_s11 = smov (!%p754_p11, %s753_s11), 4 }
 0x143   : > { %s1371_s17 = sshll.u32 %s1442_s11, 7 }
 0x144   : > { %s758_s19 = ssub.s32 512, %s1371_s17 }
 0x145   : > { %759 = vsyncadd %s1366_s10, %s758_s19  ;;  %p853_p12 = scmp.ne.s32.totalorder %s1371_s17, 0  ;;  %s859_s20 = sshll.u32 %s1068_s16, 9 }
 0x146   : > { %s1380_s26 = scalar_lea.hbm %s1430_s3, %s859_s20  ;;  %s764_s24 = sshll.u32 %s1320_s9, 4  ;;  %s1383_s24 = int_to_ptr.vmem [resolvable:$true] %s764_s24 }
 0x147   : > { %s950_s27 = scalar_lea.vmem %s1383_s24, %s1371_s17  ;;  %s1024_s28 = smov [#allocation2]  }
 0x148   : > { %p951_p13 = scmp.ne.s32.totalorder %s1383_s24, %s950_s27  ;;  %s954_s29 = sshll.u32 %s1024_s28, 4  ;;  %s955_s29 = int_to_ptr.vmem [resolvable:$false] %s954_s29 }
 0x149   : > { %s956_s16 = scalar_lea.vmem %s955_s29, 1024  ;;  %p957_p2 = scmp.lt.s32.totalorder %s1383_s24, %s955_s29 }
 0x14a   : > { %p952_p0 = pnand %p951_p13, %p853_p12  ;;  %p958_p3 = scmp.lt.s32.totalorder %s956_s16, %s950_s27 }
 0x14c   : > { %p953_p1 = pneg %p952_p0  ;;  %p959_p4 = por %p958_p3, %p957_p2 }
 0x14e   : > { %p960_p5 = pnand %p959_p4, %p953_p1 }
 0x150   : > { %963 = shalt.err (!%p960_p5)
}
 0x151   : > { %s964_s30 = scalar_lea.hbm %s1380_s26, %s1371_s17  ;;  %s968_s6 = scalar_lea.hbm %s1430_s3, 1280 }
 0x152   : > { %p965_p7 = scmp.ne.s32.totalorder %s1380_s26, %s964_s30  ;;  %p969_p10 = scmp.lt.u32.totalorder %s1380_s26, %s1430_s3 }
 0x153   : > { %p970_p11 = scmp.lt.u32.totalorder %s968_s6, %s964_s30  ;;  %p972_p0 = scmp.lt.u32.totalorder %s964_s30, %s1380_s26 }
 0x154   : > { %p966_p8 = pnand %p965_p7, %p853_p12 }
 0x155   : > { %p971_p13 = por %p970_p11, %p969_p10 }
 0x156   : > { %p967_p9 = pneg %p966_p8 }
 0x157   : > { %p973_p1 = por %p972_p0, %p971_p13 }
 0x159   : > { %p974_p2 = pnand %p973_p1, %p967_p9 }
 0x15b   : > { %977 = shalt.err (!%p974_p2)
}
 0x15c   : > { %s1025_s9 = smov 128   ;;  %s1026_s11 = smov 8  }
 0x15d   : > { %770 = dma.vmem_to_hbm [thread:$0]  (%p853_p12), %s1383_s24, %s1371_s17, %s1380_s26, %s1366_s10, %s1025_s9, %s1025_s9, %s1026_s11  }
 0x15e PF: > { %p881_p3 = scmp.ge.s32.totalorder %s1012_s15, 2  ;;  %s779_s19 = sand.u32 1, %s1000_s12  }
 0x15f   : > { %s780_s20 = scalar_lea.sflag [#allocation3], %s779_s19 }
 0x160   : > { %p878_p4 = pnand %p881_p3, %p1089_p6 }
 0x162   : > { %995 = dma.done.wait (!%p878_p4), %s780_s20, 512  }
 0x163   : > { %997 = vsyncadd (!%p878_p4), %s780_s20, 4294966784  ;;  %p13_p5 = scmp.ge.s32.totalorder %s1072_s18, 5   ;;  %s1437_s12 = smov %s1004_s13 }
 0x164   : > { %s1438_s13 = smov %s1008_s14  ;;  %s1439_s14 = smov %s1083_s21 }
 0x165   : > { %s1440_s15 = smov %s1072_s18  ;;  %15 = sbr.rel (!%p13_p5) target bundleno = 3 (0x3), region = 67 }
 0x16c   :  { %785 = vsyncpa [#allocation3], 1 }
 0x16d   :  { %787 = vsyncpa [#allocation3 + $0x1], 1 }

</bundles_post_ra>
